<compile_context>
chip_gen: v5e
topology: v5e:2x2
jax: 0.10.0
libtpu: 0.0.40
codegen_flags: <defaults>
</compile_context>

<pallas_src>
import math
import functools

import jax
import jax.numpy as jnp
from jax import lax
from jax.experimental import pallas as pl
from jax.experimental.pallas import tpu as pltpu

# ---- config (small, deterministic) ----
D_MODEL = 32
N_HEAD = 2
NORMALIZER = 16.0
EPS = 1e-5
HEAD_DIM = D_MODEL // N_HEAD               # Dv  (v head dim)
KEY_DIM = D_MODEL // (2 * N_HEAD)          # Dk  (q/k head dim)
# torch: self.key_dim = embed_dim // num_heads ; scaling = key_dim ** -0.5
SCALING = (D_MODEL // N_HEAD) ** (-0.5)

# Set to jnp.bfloat16 on v6e/v7x for native-MXU throughput (f32 accumulate,
# weights pre-cast host-side).  Kept f32 here to match the fp32 torch module.
MATMUL_DTYPE = jnp.float32


# --------------------------------------------------------- fused GLA kernel ----
def _fused_gla_kernel(x_ref, w_in_ref, b_in_ref, wo_ref,
                      causal_ref, causal_bd_ref, qmask_ref, vmask_ref,
                      hmask_ref, mavg_ref,
                      y_ref, hT_ref,
                      *, num_heads, dk, dv, bblk, chunk):
    # per (batch-block, chunk) grid point:
    #   x_ref        : (Bblk, C, D)
    #   w_in_ref     : (D, NP)   [wq | wk*scaling | wkg_eff | wv | wg]  (resident)
    #   b_in_ref     : (1, NP)   packed biases (zeros where absent)     (resident)
    #   wo_ref       : (D, D)                                           (resident)
    #   causal_ref   : (C, C)        lower-triangular 0/1               (resident)
    #   causal_bd_ref: (Bblk*C, Bblk*C)  per-batch block-diag causal    (resident)
    #   qmask_ref    : (H, H*Dk)     per-head 0/1 column masks          (resident)
    #   vmask_ref    : (H, H*Dv)                                        (resident)
    #   hmask_ref    : (H*Dv, H*Dk)  head block-diagonal state mask     (resident)
    #   mavg_ref     : (H*Dv, H*Dv)  per-head averaging matrix (1/Dv)   (resident)
    #   y_ref        : (Bblk, C, D)          layer output block
    #   hT_ref       : (Bblk, H*Dv, H*Dk)    final state S^T (block-diag by head);
    #                  resident across the chunk axis -> doubles as carried state.
    c = pl.program_id(1)

    K = num_heads * dk            # = D // 2
    V = num_heads * dv            # = D
    BC = bblk * chunk

    @pl.when(c == 0)
    def _():
        hT_ref[...] = jnp.zeros_like(hT_ref)

    x = x_ref[...].astype(jnp.float32).reshape(BC, V)

    # ---- fused projections: one (BC, D) @ (D, NP) MXU matmul ----
    proj = (jnp.dot(x.astype(MATMUL_DTYPE), w_in_ref[...],
                    preferred_element_type=jnp.float32)
            + b_in_ref[...].astype(jnp.float32))
    q = proj[:, 0:K]                         # (BC, K)
    k = proj[:, K:2 * K]                     # (BC, K)   (scaling folded in)
    a = proj[:, 2 * K:3 * K]                 # (BC, K)   k_gate pre-activation
    v = proj[:, 3 * K:3 * K + V]             # (BC, V)
    g = proj[:, 3 * K + V:3 * K + 2 * V]     # (BC, D)

    # gk = logsigmoid(a) / normalizer   (stable form)
    gk = (jnp.minimum(a, 0.0) - jnp.log(1.0 + jnp.exp(-jnp.abs(a)))) * (1.0 / NORMALIZER)

    # inclusive within-chunk cumulative gate-log, per batch row, as one matmul
    # against the resident per-batch block-diagonal causal matrix.
    G = jnp.dot(causal_bd_ref[...], gk, preferred_element_type=jnp.float32)
    eG = jnp.exp(G)
    q_g = q * eG
    k_g = k * pl.reciprocal(eG, approx=True)          # exp(-G) without a 2nd exp

    # (Bblk, C, .) views for the per-batch recurrence (leading-dim split only)
    q3 = q_g.reshape(bblk, chunk, K)
    k3 = k_g.reshape(bblk, chunk, K)
    v3 = v.reshape(bblk, chunk, V)
    eG3 = eG.reshape(bblk, chunk, K)
    g_last = eG3[:, chunk - 1:chunk, :]                # (Bblk, 1, K) = exp(G_C)
    k_state = k3 * g_last                              # k * exp(G_C - G_s)

    ST = hT_ref[...]                                   # (Bblk, V, K), block-diag by head
    # inter-chunk contribution: q_g @ S (state stored transposed)
    o = jnp.einsum('bck,bvk->bcv', q3, ST, preferred_element_type=jnp.float32)

    # intra-chunk causal attention, one head at a time via 0/1 masks (no lane slicing)
    causal = causal_ref[...]                           # (C, C)
    qmask = qmask_ref[...]                             # (H, K)
    vmask = vmask_ref[...]                             # (H, V)
    for h in range(num_heads):
        qmh = qmask[h].reshape(1, 1, K)
        vmh = vmask[h].reshape(1, 1, V)
        A = jnp.einsum('bck,bsk->bcs', q3 * qmh, k3,
                       preferred_element_type=jnp.float32)       # (Bblk, C, C)
        A = A * causal
        o = o + jnp.einsum('bcs,bsv->bcv', A, v3 * vmh,
                           preferred_element_type=jnp.float32)   # (Bblk, C, V)

    # state update (transposed): S'^T = S^T * exp(G_C) + sum_s v_s (k_s exp(G_C-G_s))^T
    kvT = jnp.einsum('bcv,bck->bvk', v3, k_state, preferred_element_type=jnp.float32)
    hT_ref[...] = (ST * g_last + kvT * hmask_ref[...]).astype(hT_ref.dtype)

    # per-head group_norm (LayerNorm over Dv, eps, no affine) on packed heads:
    # mean/var per head block via one small matmul each — no head splitting.
    o = o.reshape(BC, V)
    mavg = mavg_ref[...]
    mean = jnp.dot(o, mavg, preferred_element_type=jnp.float32)
    xc = o - mean
    var = jnp.dot(xc * xc, mavg, preferred_element_type=jnp.float32)
    o_n = xc * lax.rsqrt(var + EPS)

    # silu(g) gate fused with out_proj
    sig = pl.reciprocal(1.0 + jnp.exp(-g), approx=True)
    gated = o_n * (g * sig)
    y = jnp.dot(gated.astype(MATMUL_DTYPE), wo_ref[...],
                preferred_element_type=jnp.float32)
    y_ref[...] = y.reshape(bblk, chunk, V).astype(y_ref.dtype)


def pallas_fused_gla(x, w_in, b_in, wo, *, num_heads, dk, dv, chunk=64, max_rows=512):
    """Whole GLA layer in one pallas_call.

    Returns (y: (B, L, D), hT: (B, H*Dv, H*Dk) head-block-diagonal final state S^T).
    """
    B, L, D = x.shape
    C = min(chunk, L)
    assert L % C == 0, "sequence length must be a multiple of the chunk size"
    nc = L // C
    K = num_heads * dk
    V = num_heads * dv
    NP = w_in.shape[1]

    # Fold batch rows per grid step (amortize per-step overhead, fill the MXU M dim),
    # but keep >=2 batch blocks when B allows so both v7x TensorCores get work.
    bblk = max(1, min(B, max_rows // C))
    if B >= 2 and B // bblk < 2:
        bblk = max(1, B // 2)
    while B % bblk:
        bblk -= 1
    nb = B // bblk
    BC = bblk * C

    f32 = jnp.float32
    causal = jnp.tril(jnp.ones((C, C), f32))
    causal_bd = jnp.kron(jnp.eye(bblk, dtype=f32), causal)                 # (BC, BC)
    qmask = jnp.kron(jnp.eye(num_heads, dtype=f32), jnp.ones((1, dk), f32))   # (H, K)
    vmask = jnp.kron(jnp.eye(num_heads, dtype=f32), jnp.ones((1, dv), f32))   # (H, V)
    hmask = jnp.kron(jnp.eye(num_heads, dtype=f32), jnp.ones((dv, dk), f32))  # (V, K)
    mavg = jnp.kron(jnp.eye(num_heads, dtype=f32),
                    jnp.full((dv, dv), 1.0 / dv, f32))                        # (V, V)

    kernel = functools.partial(_fused_gla_kernel, num_heads=num_heads, dk=dk, dv=dv,
                               bblk=bblk, chunk=C)

    wbytes = int(w_in.size * w_in.dtype.itemsize + wo.size * wo.dtype.itemsize
                 + b_in.size * 4 + causal.size * 4 + causal_bd.size * 4
                 + qmask.size * 4 + vmask.size * 4 + hmask.size * 4 + mavg.size * 4)
    flops = int(2 * B * L * D * (NP + D)                       # projections + out_proj
                + 2 * B * L * C * (K + V) * num_heads          # intra-chunk attention
                + 4 * B * L * K * V                            # inter-chunk + state
                + 4 * B * L * V * V)                           # group-norm matmuls
    cost = pl.CostEstimate(flops=flops,
                           transcendentals=int(B * L * (3 * K + D)),
                           bytes_accessed=int(2 * B * L * D * 4 + B * V * K * 4 + wbytes))

    vmem_est = int(4 * BC * D * 4                  # x/y blocks, double-buffered
                   + 2 * wbytes                    # resident operands
                   + 8 * BC * NP * 4               # projection intermediates
                   + 4 * bblk * C * C * 4)         # per-head attention matrices
    vmem_limit = int(min(64 * 1024 * 1024, max(32 * 1024 * 1024, 2 * vmem_est)))

    y, hT = pl.pallas_call(
        kernel,
        out_shape=(
            jax.ShapeDtypeStruct((B, L, D), jnp.float32),
            jax.ShapeDtypeStruct((B, V, K), jnp.float32),
        ),
        grid=(nb, nc),
        in_specs=[
            pl.BlockSpec((bblk, C, D), lambda b, c: (b, c, 0)),     # x block
            pl.BlockSpec((D, NP), lambda b, c: (0, 0)),             # fused in-proj (resident)
            pl.BlockSpec((1, NP), lambda b, c: (0, 0)),             # fused bias    (resident)
            pl.BlockSpec((D, D), lambda b, c: (0, 0)),              # out_proj      (resident)
            pl.BlockSpec((C, C), lambda b, c: (0, 0)),              # causal mask   (resident)
            pl.BlockSpec((BC, BC), lambda b, c: (0, 0)),            # block-diag causal (resident)
            pl.BlockSpec((num_heads, K), lambda b, c: (0, 0)),      # per-head q/k masks
            pl.BlockSpec((num_heads, V), lambda b, c: (0, 0)),      # per-head v masks
            pl.BlockSpec((V, K), lambda b, c: (0, 0)),              # head block-diag state mask
            pl.BlockSpec((V, V), lambda b, c: (0, 0)),              # group-norm averaging matrix
        ],
        out_specs=(
            pl.BlockSpec((bblk, C, D), lambda b, c: (b, c, 0)),
            # Resident across the chunk axis (constant index on c): this block IS the
            # carried recurrent state.  Requires the c axis to stay serial/"arbitrary".
            pl.BlockSpec((bblk, V, K), lambda b, c: (b, 0, 0)),
        ),
        compiler_params=pltpu.CompilerParams(
            dimension_semantics=("parallel", "arbitrary"),
            vmem_limit_bytes=vmem_limit),
        cost_estimate=cost,
    )(x, w_in, b_in, wo, causal, causal_bd, qmask, vmask, hmask, mavg)
    return y, hT


# ------------------------------------------------------------ full forward ----
def gla_forward(x, params):
    B, L, D = x.shape
    H = N_HEAD
    Dv = D // H
    Dk = D // (2 * H)

    # Fold the whole input side into ONE weight matrix:
    #  - k_proj scaling folded into its (bias-free) weights
    #  - two-stage k_gate collapsed: wkg_eff = wkg1 @ wkg2 (pure linear chain)
    wkg_eff = params["wkg1"] @ params["wkg2"]
    w_in = jnp.concatenate(
        [params["wq"], params["wk"] * SCALING, wkg_eff, params["wv"], params["wg"]],
        axis=1).astype(MATMUL_DTYPE)                      # pre-cast host-side (bf16 option)
    b_in = jnp.concatenate(
        [jnp.zeros((D // 2,), jnp.float32), jnp.zeros((D // 2,), jnp.float32),
         params["bkg2"].astype(jnp.float32),
         jnp.zeros((D,), jnp.float32), params["bg"].astype(jnp.float32)]
    ).reshape(1, -1)
    wo = params["wo"].astype(MATMUL_DTYPE)

    y, hT = pallas_fused_gla(x, w_in, b_in, wo, num_heads=H, dk=Dk, dv=Dv)

    # extract the per-head blocks of the block-diagonal transposed state -> (B, H, Dk, Dv)
    h_state = jnp.stack(
        [hT[:, h * Dv:(h + 1) * Dv, h * Dk:(h + 1) * Dk] for h in range(H)], axis=1)
    return y, jnp.swapaxes(h_state, -1, -2)


# ----------------------------------------------------------------- params ----
def init_params(key):
    ks = jax.random.split(key, 9)
    gain = 2.0 ** (-2.5)
    D = D_MODEL

    def xavier(k, fan_in, fan_out):                 # torch xavier_uniform_, stored (in,out)
        a = gain * math.sqrt(6.0 / (fan_in + fan_out))
        return jax.random.uniform(k, (fan_in, fan_out), jnp.float32, -a, a)

    def default_lin(k, fan_in, fan_out):            # deterministic stand-in for torch default
        a = 1.0 / math.sqrt(fan_in)
        return jax.random.uniform(k, (fan_in, fan_out), jnp.float32, -a, a)

    return {
        "wq": xavier(ks[0], D, D // 2),
        "wk": xavier(ks[1], D, D // 2),
        "wkg1": xavier(ks[2], D, 16),
        "wkg2": xavier(ks[3], 16, D // 2),
        "bkg2": jax.random.uniform(ks[4], (D // 2,), jnp.float32, -0.25, 0.25),
        "wv": default_lin(ks[5], D, D),
        "wg": default_lin(ks[6], D, D),
        "bg": jax.random.uniform(ks[7], (D,), jnp.float32,
                                 -1.0 / math.sqrt(D), 1.0 / math.sqrt(D)),
        "wo": default_lin(ks[8], D, D),
    }


# ------------------------------------------------- pure-JAX reference check ----
def reference_forward(x, params):
    B, L, D = x.shape
    H = N_HEAD
    Dv = D // H
    Dk = D // (2 * H)
    xf = x.reshape(B * L, D)
    q = xf @ params["wq"]
    k = (xf @ params["wk"]) * SCALING
    kg = (xf @ params["wkg1"]) @ params["wkg2"] + params["bkg2"]
    v = xf @ params["wv"]
    g = xf @ params["wg"] + params["bg"]
    gk = jax.nn.log_sigmoid(kg) / NORMALIZER

    def split_heads(t, d):
        return t.reshape(B, L, H, d).transpose(0, 2, 1, 3)

    qh, kh, gkh, vh = split_heads(q, Dk), split_heads(k, Dk), split_heads(gk, Dk), split_heads(v, Dv)

    def step(S, inp):
        qt, kt, vt, gt = inp
        S = S * jnp.exp(gt)[:, None] + kt[:, None] * vt[None, :]
        return S, qt @ S

    def per_head(qb, kb, vb, gb):
        S0 = jnp.zeros((Dk, Dv), jnp.float32)
        S, o = lax.scan(step, S0, (qb, kb, vb, gb))
        return o, S

    o, S = jax.vmap(jax.vmap(per_head))(qh, kh, vh, gkh)
    mean = o.mean(-1, keepdims=True)
    var = ((o - mean) ** 2).mean(-1, keepdims=True)
    o = (o - mean) / jnp.sqrt(var + EPS)
    o = o.transpose(0, 2, 1, 3).reshape(B * L, D)
    y = (jax.nn.silu(g) * o) @ params["wo"]
    return y.reshape(B, L, D), S


def _run_case(params, key, B, L):
    x = jax.random.normal(key, (B, L, D_MODEL), jnp.float32)
    y, h = jax.jit(gla_forward)(x, params)
    jax.block_until_ready((y, h))
    y_ref, h_ref = reference_forward(x, params)
    assert y.shape == (B, L, D_MODEL)
    assert h.shape == (B, N_HEAD, KEY_DIM, HEAD_DIM)
    assert jnp.allclose(y, y_ref, rtol=2e-2, atol=2e-2), float(jnp.max(jnp.abs(y - y_ref)))
    assert jnp.allclose(h, h_ref, rtol=2e-2, atol=2e-2), float(jnp.max(jnp.abs(h - h_ref)))


if __name__ == "__main__":
    key = jax.random.PRNGKey(0)
    kp, kx1, kx2 = jax.random.split(key, 3)
    params = init_params(kp)

    # small case from the module spec (single chunk, single batch block per step)
    _run_case(params, kx1, B=2, L=8)
    # larger case exercising multi-chunk state carry and batch-row folding
    _run_case(params, kx2, B=4, L=128)

    print("KERNEL_OK")
</pallas_src>

<mosaic_0001>
module attributes {stable_mosaic.version = 11 : i64} {
  func.func @_fused_gla_kernel(%arg0: i32, %arg1: i32, %arg2: memref<1x8x32xf32, #tpu.memory_space<vmem>>, %arg3: memref<32x112xf32, #tpu.memory_space<vmem>>, %arg4: memref<1x112xf32, #tpu.memory_space<vmem>>, %arg5: memref<32x32xf32, #tpu.memory_space<vmem>>, %arg6: memref<8x8xf32, #tpu.memory_space<vmem>>, %arg7: memref<8x8xf32, #tpu.memory_space<vmem>>, %arg8: memref<2x16xf32, #tpu.memory_space<vmem>>, %arg9: memref<2x32xf32, #tpu.memory_space<vmem>>, %arg10: memref<32x16xf32, #tpu.memory_space<vmem>>, %arg11: memref<32x32xf32, #tpu.memory_space<vmem>>, %arg12: memref<1x8x32xf32, #tpu.memory_space<vmem>>, %arg13: memref<1x32x16xf32, #tpu.memory_space<vmem>>) attributes {dimension_semantics = [#tpu.dimension_semantics<parallel>, #tpu.dimension_semantics<arbitrary>], iteration_bounds = array<i64: 2, 1>, scalar_prefetch = 0 : i64, scratch_operands = 0 : i64, tpu.core_type = #tpu.core_type<tc>, window_params = [{transform_indices = @transform_0, window_bounds = array<i64: 1, 8, 32>}, {pipeline_mode = #tpu.pipeline_mode<synchronous>, transform_indices = @transform_1, window_bounds = array<i64: 32, 112>}, {pipeline_mode = #tpu.pipeline_mode<synchronous>, transform_indices = @transform_2, window_bounds = array<i64: 1, 112>}, {pipeline_mode = #tpu.pipeline_mode<synchronous>, transform_indices = @transform_3, window_bounds = array<i64: 32, 32>}, {pipeline_mode = #tpu.pipeline_mode<synchronous>, transform_indices = @transform_4, window_bounds = array<i64: 8, 8>}, {pipeline_mode = #tpu.pipeline_mode<synchronous>, transform_indices = @transform_5, window_bounds = array<i64: 8, 8>}, {pipeline_mode = #tpu.pipeline_mode<synchronous>, transform_indices = @transform_6, window_bounds = array<i64: 2, 16>}, {pipeline_mode = #tpu.pipeline_mode<synchronous>, transform_indices = @transform_7, window_bounds = array<i64: 2, 32>}, {pipeline_mode = #tpu.pipeline_mode<synchronous>, transform_indices = @transform_8, window_bounds = array<i64: 32, 16>}, {pipeline_mode = #tpu.pipeline_mode<synchronous>, transform_indices = @transform_9, window_bounds = array<i64: 32, 32>}, {transform_indices = @transform_10, window_bounds = array<i64: 1, 8, 32>}, {transform_indices = @transform_11, window_bounds = array<i64: 1, 32, 16>}]} {
    %c0_i32 = arith.constant 0 : i32
    %0 = arith.cmpi eq, %arg1, %c0_i32 : i32
    %1 = arith.extui %0 : i1 to i32
    %c0_i32_0 = arith.constant 0 : i32
    %2 = arith.cmpi ne, %1, %c0_i32_0 : i32
    scf.if %2 {
      %cst_47 = arith.constant 0.000000e+00 : f32
      %105 = vector.broadcast %cst_47 : f32 to vector<1x32x16xf32>
      %c0_48 = arith.constant 0 : index
      %c0_49 = arith.constant 0 : index
      %c0_50 = arith.constant 0 : index
      %106 = vector.load %arg13[%c0_48, %c0_49, %c0_50] : memref<1x32x16xf32, #tpu.memory_space<vmem>>, vector<1x32x16xf32>
      tpu.vector_store %arg13[%c0_48, %c0_49, %c0_50], %105 {strides = array<i32>} : memref<1x32x16xf32, #tpu.memory_space<vmem>>, vector<1x32x16xf32>,
    } else {
    }
    %c0 = arith.constant 0 : index
    %c0_1 = arith.constant 0 : index
    %c0_2 = arith.constant 0 : index
    %3 = vector.load %arg2[%c0, %c0_1, %c0_2] : memref<1x8x32xf32, #tpu.memory_space<vmem>>, vector<1x8x32xf32>
    %4 = vector.shape_cast %3 : vector<1x8x32xf32> to vector<8x32xf32>
    %c0_3 = arith.constant 0 : index
    %c0_4 = arith.constant 0 : index
    %5 = vector.load %arg3[%c0_3, %c0_4] : memref<32x112xf32, #tpu.memory_space<vmem>>, vector<32x112xf32>
    %cst = arith.constant dense<0.000000e+00> : vector<8x112xf32>
    %6 = tpu.matmul %4, %5, %cst {dimension_numbers = #tpu.dot_dimension_numbers<[1], [0], [0], [1], [0, 0, 1, 1], [], []>} : vector<8x32xf32>, vector<32x112xf32>, vector<8x112xf32> -> vector<8x112xf32>
    %c0_5 = arith.constant 0 : index
    %c0_6 = arith.constant 0 : index
    %7 = vector.load %arg4[%c0_5, %c0_6] : memref<1x112xf32, #tpu.memory_space<vmem>>, vector<1x112xf32>
    %8 = vector.broadcast %7 : vector<1x112xf32> to vector<8x112xf32>
    %9 = arith.addf %6, %8 : vector<8x112xf32>
    %10 = vector.extract_strided_slice %9 {offsets = [0, 0], sizes = [8, 16], strides = [1, 1]} : vector<8x112xf32> to vector<8x16xf32>
    %11 = vector.extract_strided_slice %9 {offsets = [0, 16], sizes = [8, 16], strides = [1, 1]} : vector<8x112xf32> to vector<8x16xf32>
    %12 = vector.extract_strided_slice %9 {offsets = [0, 32], sizes = [8, 16], strides = [1, 1]} : vector<8x112xf32> to vector<8x16xf32>
    %13 = vector.extract_strided_slice %9 {offsets = [0, 48], sizes = [8, 32], strides = [1, 1]} : vector<8x112xf32> to vector<8x32xf32>
    %14 = vector.extract_strided_slice %9 {offsets = [0, 80], sizes = [8, 32], strides = [1, 1]} : vector<8x112xf32> to vector<8x32xf32>
    %cst_7 = arith.constant 0.000000e+00 : f32
    %15 = vector.broadcast %cst_7 : f32 to vector<8x16xf32>
    %16 = arith.minimumf %12, %15 : vector<8x16xf32>
    %17 = math.absf %12 : vector<8x16xf32>
    %cst_8 = arith.constant 0.000000e+00 : f32
    %18 = vector.broadcast %cst_8 : f32 to vector<8x16xf32>
    %19 = arith.subf %18, %17 : vector<8x16xf32>
    %20 = math.exp %19 : vector<8x16xf32>
    %cst_9 = arith.constant 1.000000e+00 : f32
    %21 = vector.broadcast %cst_9 : f32 to vector<8x16xf32>
    %22 = arith.addf %21, %20 : vector<8x16xf32>
    %23 = math.log %22 : vector<8x16xf32>
    %24 = arith.subf %16, %23 : vector<8x16xf32>
    %cst_10 = arith.constant 6.250000e-02 : f32
    %25 = vector.broadcast %cst_10 : f32 to vector<8x16xf32>
    %26 = arith.mulf %24, %25 : vector<8x16xf32>
    %c0_11 = arith.constant 0 : index
    %c0_12 = arith.constant 0 : index
    %27 = vector.load %arg7[%c0_11, %c0_12] : memref<8x8xf32, #tpu.memory_space<vmem>>, vector<8x8xf32>
    %cst_13 = arith.constant dense<0.000000e+00> : vector<8x16xf32>
    %28 = tpu.matmul %27, %26, %cst_13 {dimension_numbers = #tpu.dot_dimension_numbers<[1], [0], [0], [1], [0, 0, 1, 1], [], []>} : vector<8x8xf32>, vector<8x16xf32>, vector<8x16xf32> -> vector<8x16xf32>
    %29 = math.exp %28 : vector<8x16xf32>
    %30 = arith.mulf %10, %29 : vector<8x16xf32>
    %31 = tpu.reciprocal %29 {approx = true} : vector<8x16xf32> -> vector<8x16xf32>
    %32 = arith.mulf %11, %31 : vector<8x16xf32>
    %33 = vector.shape_cast %30 : vector<8x16xf32> to vector<1x8x16xf32>
    %34 = vector.shape_cast %32 : vector<8x16xf32> to vector<1x8x16xf32>
    %35 = vector.shape_cast %13 : vector<8x32xf32> to vector<1x8x32xf32>
    %36 = vector.shape_cast %29 : vector<8x16xf32> to vector<1x8x16xf32>
    %37 = vector.extract_strided_slice %36 {offsets = [0, 7, 0], sizes = [1, 1, 16], strides = [1, 1, 1]} : vector<1x8x16xf32> to vector<1x1x16xf32>
    %38 = vector.broadcast %37 : vector<1x1x16xf32> to vector<1x8x16xf32>
    %39 = arith.mulf %34, %38 : vector<1x8x16xf32>
    %c0_14 = arith.constant 0 : index
    %c0_15 = arith.constant 0 : index
    %c0_16 = arith.constant 0 : index
    %40 = vector.load %arg13[%c0_14, %c0_15, %c0_16] : memref<1x32x16xf32, #tpu.memory_space<vmem>>, vector<1x32x16xf32>
    "tpu.trace_start"() <{level = 10 : i32, message = "bck,bvk->bcv"}> : () -> ()
    %cst_17 = arith.constant dense<0.000000e+00> : vector<1x8x32xf32>
    %41 = tpu.matmul %33, %40, %cst_17 {dimension_numbers = #tpu.dot_dimension_numbers<[2], [2], [1], [1], [0, 0, 0, 1, 1, 1], [0], [0]>} : vector<1x8x16xf32>, vector<1x32x16xf32>, vector<1x8x32xf32> -> vector<1x8x32xf32>
    "tpu.trace_stop"() : () -> ()
    %c0_18 = arith.constant 0 : index
    %c0_19 = arith.constant 0 : index
    %42 = vector.load %arg6[%c0_18, %c0_19] : memref<8x8xf32, #tpu.memory_space<vmem>>, vector<8x8xf32>
    %c0_20 = arith.constant 0 : index
    %c0_21 = arith.constant 0 : index
    %43 = vector.load %arg8[%c0_20, %c0_21] : memref<2x16xf32, #tpu.memory_space<vmem>>, vector<2x16xf32>
    %c0_22 = arith.constant 0 : index
    %c0_23 = arith.constant 0 : index
    %44 = vector.load %arg9[%c0_22, %c0_23] : memref<2x32xf32, #tpu.memory_space<vmem>>, vector<2x32xf32>
    %45 = vector.extract_strided_slice %43 {offsets = [0, 0], sizes = [1, 16], strides = [1, 1]} : vector<2x16xf32> to vector<1x16xf32>
    %46 = vector.shape_cast %45 : vector<1x16xf32> to vector<16xf32>
    %47 = vector.shape_cast %46 : vector<16xf32> to vector<1x1x16xf32>
    %48 = vector.extract_strided_slice %44 {offsets = [0, 0], sizes = [1, 32], strides = [1, 1]} : vector<2x32xf32> to vector<1x32xf32>
    %49 = vector.shape_cast %48 : vector<1x32xf32> to vector<32xf32>
    %50 = vector.shape_cast %49 : vector<32xf32> to vector<1x1x32xf32>
    %51 = vector.broadcast %47 : vector<1x1x16xf32> to vector<1x8x16xf32>
    %52 = arith.mulf %33, %51 : vector<1x8x16xf32>
    "tpu.trace_start"() <{level = 10 : i32, message = "bck,bsk->bcs"}> : () -> ()
    %cst_24 = arith.constant dense<0.000000e+00> : vector<1x8x8xf32>
    %53 = tpu.matmul %52, %34, %cst_24 {dimension_numbers = #tpu.dot_dimension_numbers<[2], [2], [1], [1], [0, 0, 0, 1, 1, 1], [0], [0]>} : vector<1x8x16xf32>, vector<1x8x16xf32>, vector<1x8x8xf32> -> vector<1x8x8xf32>
    "tpu.trace_stop"() : () -> ()
    %54 = vector.shape_cast %42 : vector<8x8xf32> to vector<1x8x8xf32>
    %55 = arith.mulf %53, %54 : vector<1x8x8xf32>
    %56 = vector.broadcast %50 : vector<1x1x32xf32> to vector<1x8x32xf32>
    %57 = arith.mulf %35, %56 : vector<1x8x32xf32>
    "tpu.trace_start"() <{level = 10 : i32, message = "bcs,bsv->bcv"}> : () -> ()
    %cst_25 = arith.constant dense<0.000000e+00> : vector<1x8x32xf32>
    %58 = tpu.matmul %55, %57, %cst_25 {dimension_numbers = #tpu.dot_dimension_numbers<[2], [1], [1], [2], [0, 0, 0, 1, 1, 2], [0], [0]>} : vector<1x8x8xf32>, vector<1x8x32xf32>, vector<1x8x32xf32> -> vector<1x8x32xf32>
    "tpu.trace_stop"() : () -> ()
    %59 = arith.addf %41, %58 : vector<1x8x32xf32>
    %60 = vector.extract_strided_slice %43 {offsets = [1, 0], sizes = [1, 16], strides = [1, 1]} : vector<2x16xf32> to vector<1x16xf32>
    %61 = vector.shape_cast %60 : vector<1x16xf32> to vector<16xf32>
    %62 = vector.shape_cast %61 : vector<16xf32> to vector<1x1x16xf32>
    %63 = vector.extract_strided_slice %44 {offsets = [1, 0], sizes = [1, 32], strides = [1, 1]} : vector<2x32xf32> to vector<1x32xf32>
    %64 = vector.shape_cast %63 : vector<1x32xf32> to vector<32xf32>
    %65 = vector.shape_cast %64 : vector<32xf32> to vector<1x1x32xf32>
    %66 = vector.broadcast %62 : vector<1x1x16xf32> to vector<1x8x16xf32>
    %67 = arith.mulf %33, %66 : vector<1x8x16xf32>
    "tpu.trace_start"() <{level = 10 : i32, message = "bck,bsk->bcs"}> : () -> ()
    %cst_26 = arith.constant dense<0.000000e+00> : vector<1x8x8xf32>
    %68 = tpu.matmul %67, %34, %cst_26 {dimension_numbers = #tpu.dot_dimension_numbers<[2], [2], [1], [1], [0, 0, 0, 1, 1, 1], [0], [0]>} : vector<1x8x16xf32>, vector<1x8x16xf32>, vector<1x8x8xf32> -> vector<1x8x8xf32>
    "tpu.trace_stop"() : () -> ()
    %69 = vector.shape_cast %42 : vector<8x8xf32> to vector<1x8x8xf32>
    %70 = arith.mulf %68, %69 : vector<1x8x8xf32>
    %71 = vector.broadcast %65 : vector<1x1x32xf32> to vector<1x8x32xf32>
    %72 = arith.mulf %35, %71 : vector<1x8x32xf32>
    "tpu.trace_start"() <{level = 10 : i32, message = "bcs,bsv->bcv"}> : () -> ()
    %cst_27 = arith.constant dense<0.000000e+00> : vector<1x8x32xf32>
    %73 = tpu.matmul %70, %72, %cst_27 {dimension_numbers = #tpu.dot_dimension_numbers<[2], [1], [1], [2], [0, 0, 0, 1, 1, 2], [0], [0]>} : vector<1x8x8xf32>, vector<1x8x32xf32>, vector<1x8x32xf32> -> vector<1x8x32xf32>
    "tpu.trace_stop"() : () -> ()
    %74 = arith.addf %59, %73 : vector<1x8x32xf32>
    "tpu.trace_start"() <{level = 10 : i32, message = "bcv,bck->bvk"}> : () -> ()
    %cst_28 = arith.constant dense<0.000000e+00> : vector<1x32x16xf32>
    %75 = tpu.matmul %35, %39, %cst_28 {dimension_numbers = #tpu.dot_dimension_numbers<[1], [1], [2], [2], [0, 0, 0, 2, 1, 2], [0], [0]>} : vector<1x8x32xf32>, vector<1x8x16xf32>, vector<1x32x16xf32> -> vector<1x32x16xf32>
    "tpu.trace_stop"() : () -> ()
    %76 = vector.broadcast %37 : vector<1x1x16xf32> to vector<1x32x16xf32>
    %77 = arith.mulf %40, %76 : vector<1x32x16xf32>
    %c0_29 = arith.constant 0 : index
    %c0_30 = arith.constant 0 : index
    %78 = vector.load %arg10[%c0_29, %c0_30] : memref<32x16xf32, #tpu.memory_space<vmem>>, vector<32x16xf32>
    %79 = vector.shape_cast %78 : vector<32x16xf32> to vector<1x32x16xf32>
    %80 = arith.mulf %75, %79 : vector<1x32x16xf32>
    %81 = arith.addf %77, %80 : vector<1x32x16xf32>
    %c0_31 = arith.constant 0 : index
    %c0_32 = arith.constant 0 : index
    %c0_33 = arith.constant 0 : index
    %82 = vector.load %arg13[%c0_31, %c0_32, %c0_33] : memref<1x32x16xf32, #tpu.memory_space<vmem>>, vector<1x32x16xf32>
    tpu.vector_store %arg13[%c0_31, %c0_32, %c0_33], %81 {strides = array<i32>} : memref<1x32x16xf32, #tpu.memory_space<vmem>>, vector<1x32x16xf32>,
    %83 = vector.shape_cast %74 : vector<1x8x32xf32> to vector<8x32xf32>
    %c0_34 = arith.constant 0 : index
    %c0_35 = arith.constant 0 : index
    %84 = vector.load %arg11[%c0_34, %c0_35] : memref<32x32xf32, #tpu.memory_space<vmem>>, vector<32x32xf32>
    %cst_36 = arith.constant dense<0.000000e+00> : vector<8x32xf32>
    %85 = tpu.matmul %83, %84, %cst_36 {dimension_numbers = #tpu.dot_dimension_numbers<[1], [0], [0], [1], [0, 0, 1, 1], [], []>} : vector<8x32xf32>, vector<32x32xf32>, vector<8x32xf32> -> vector<8x32xf32>
    %86 = arith.subf %83, %85 : vector<8x32xf32>
    %87 = arith.mulf %86, %86 : vector<8x32xf32>
    %cst_37 = arith.constant dense<0.000000e+00> : vector<8x32xf32>
    %88 = tpu.matmul %87, %84, %cst_37 {dimension_numbers = #tpu.dot_dimension_numbers<[1], [0], [0], [1], [0, 0, 1, 1], [], []>} : vector<8x32xf32>, vector<32x32xf32>, vector<8x32xf32> -> vector<8x32xf32>
    %cst_38 = arith.constant 9.99999974E-6 : f32
    %89 = vector.broadcast %cst_38 : f32 to vector<8x32xf32>
    %90 = arith.addf %88, %89 : vector<8x32xf32>
    %91 = math.rsqrt %90 : vector<8x32xf32>
    %92 = arith.mulf %86, %91 : vector<8x32xf32>
    %cst_39 = arith.constant 0.000000e+00 : f32
    %93 = vector.broadcast %cst_39 : f32 to vector<8x32xf32>
    %94 = arith.subf %93, %14 : vector<8x32xf32>
    %95 = math.exp %94 : vector<8x32xf32>
    %cst_40 = arith.constant 1.000000e+00 : f32
    %96 = vector.broadcast %cst_40 : f32 to vector<8x32xf32>
    %97 = arith.addf %96, %95 : vector<8x32xf32>
    %98 = tpu.reciprocal %97 {approx = true} : vector<8x32xf32> -> vector<8x32xf32>
    %99 = arith.mulf %14, %98 : vector<8x32xf32>
    %100 = arith.mulf %92, %99 : vector<8x32xf32>
    %c0_41 = arith.constant 0 : index
    %c0_42 = arith.constant 0 : index
    %101 = vector.load %arg5[%c0_41, %c0_42] : memref<32x32xf32, #tpu.memory_space<vmem>>, vector<32x32xf32>
    %cst_43 = arith.constant dense<0.000000e+00> : vector<8x32xf32>
    %102 = tpu.matmul %100, %101, %cst_43 {dimension_numbers = #tpu.dot_dimension_numbers<[1], [0], [0], [1], [0, 0, 1, 1], [], []>} : vector<8x32xf32>, vector<32x32xf32>, vector<8x32xf32> -> vector<8x32xf32>
    %103 = vector.shape_cast %102 : vector<8x32xf32> to vector<1x8x32xf32>
    %c0_44 = arith.constant 0 : index
    %c0_45 = arith.constant 0 : index
    %c0_46 = arith.constant 0 : index
    %104 = vector.load %arg12[%c0_44, %c0_45, %c0_46] : memref<1x8x32xf32, #tpu.memory_space<vmem>>, vector<1x8x32xf32>
    tpu.vector_store %arg12[%c0_44, %c0_45, %c0_46], %103 {strides = array<i32>} : memref<1x8x32xf32, #tpu.memory_space<vmem>>, vector<1x8x32xf32>,
    return
  }
  func.func @transform_0(%arg0: i32, %arg1: i32) -> (i32, i32, i32) {
    %c0_i32 = arith.constant 0 : i32
    %c0_i32_0 = arith.constant 0 : i32
    return %arg0, %arg1, %c0_i32 : i32, i32, i32
  }
  func.func @transform_1(%arg0: i32, %arg1: i32) -> (i32, i32) {
    %c0_i32 = arith.constant 0 : i32
    %c0_i32_0 = arith.constant 0 : i32
    %c0_i32_1 = arith.constant 0 : i32
    return %c0_i32, %c0_i32_0 : i32, i32
  }
  func.func @transform_2(%arg0: i32, %arg1: i32) -> (i32, i32) {
    %c0_i32 = arith.constant 0 : i32
    %c0_i32_0 = arith.constant 0 : i32
    %c0_i32_1 = arith.constant 0 : i32
    return %c0_i32, %c0_i32_0 : i32, i32
  }
  func.func @transform_3(%arg0: i32, %arg1: i32) -> (i32, i32) {
    %c0_i32 = arith.constant 0 : i32
    %c0_i32_0 = arith.constant 0 : i32
    %c0_i32_1 = arith.constant 0 : i32
    return %c0_i32, %c0_i32_0 : i32, i32
  }
  func.func @transform_4(%arg0: i32, %arg1: i32) -> (i32, i32) {
    %c0_i32 = arith.constant 0 : i32
    %c0_i32_0 = arith.constant 0 : i32
    %c0_i32_1 = arith.constant 0 : i32
    return %c0_i32, %c0_i32_0 : i32, i32
  }
  func.func @transform_5(%arg0: i32, %arg1: i32) -> (i32, i32) {
    %c0_i32 = arith.constant 0 : i32
    %c0_i32_0 = arith.constant 0 : i32
    %c0_i32_1 = arith.constant 0 : i32
    return %c0_i32, %c0_i32_0 : i32, i32
  }
  func.func @transform_6(%arg0: i32, %arg1: i32) -> (i32, i32) {
    %c0_i32 = arith.constant 0 : i32
    %c0_i32_0 = arith.constant 0 : i32
    %c0_i32_1 = arith.constant 0 : i32
    return %c0_i32, %c0_i32_0 : i32, i32
  }
  func.func @transform_7(%arg0: i32, %arg1: i32) -> (i32, i32) {
    %c0_i32 = arith.constant 0 : i32
    %c0_i32_0 = arith.constant 0 : i32
    %c0_i32_1 = arith.constant 0 : i32
    return %c0_i32, %c0_i32_0 : i32, i32
  }
  func.func @transform_8(%arg0: i32, %arg1: i32) -> (i32, i32) {
    %c0_i32 = arith.constant 0 : i32
    %c0_i32_0 = arith.constant 0 : i32
    %c0_i32_1 = arith.constant 0 : i32
    return %c0_i32, %c0_i32_0 : i32, i32
  }
  func.func @transform_9(%arg0: i32, %arg1: i32) -> (i32, i32) {
    %c0_i32 = arith.constant 0 : i32
    %c0_i32_0 = arith.constant 0 : i32
    %c0_i32_1 = arith.constant 0 : i32
    return %c0_i32, %c0_i32_0 : i32, i32
  }
  func.func @transform_10(%arg0: i32, %arg1: i32) -> (i32, i32, i32) {
    %c0_i32 = arith.constant 0 : i32
    %c0_i32_0 = arith.constant 0 : i32
    return %arg0, %arg1, %c0_i32 : i32, i32, i32
  }
  func.func @transform_11(%arg0: i32, %arg1: i32) -> (i32, i32, i32) {
    %c0_i32 = arith.constant 0 : i32
    %c0_i32_0 = arith.constant 0 : i32
    %c0_i32_1 = arith.constant 0 : i32
    return %arg0, %c0_i32, %c0_i32_0 : i32, i32, i32
  }
}

</mosaic_0001>

<bundles_post_ra>
// kernel: gla_forward.1
= control target key start
LH: loop header
LB: loop body
LE: loop exit
PB: predicated region body
PF: predicated region fallthrough
CT: control target
= control target key end

     0   :  { %s1517_s0 = inlined_call_operand.vmem [shape: f32[2,8,32], index: 0, kind: input, shape index: {}]   ;;  %s1518_s1 = inlined_call_operand.vmem [shape: f32[32,112], index: 1, kind: input, shape index: {}]   ;;  %s1519_s2 = inlined_call_operand.vmem [shape: f32[1,112], index: 2, kind: input, shape index: {}]   ;;  %s1520_s3 = inlined_call_operand.vmem [shape: f32[32,32], index: 3, kind: input, shape index: {}]   ;;  %s1521_s4 = inlined_call_operand.vmem [shape: f32[8,8], index: 4, kind: input, shape index: {}, may-alias: {4,5}]   ;;  %s1522_s5 = inlined_call_operand.vmem [shape: f32[8,8], index: 5, kind: input, shape index: {}, may-alias: {4,5}]   ;;  %s1523_s6 = inlined_call_operand.vmem [shape: f32[2,16], index: 6, kind: input, shape index: {}]   ;;  %s1524_s7 = inlined_call_operand.vmem [shape: f32[2,32], index: 7, kind: input, shape index: {}]   ;;  %s1525_s8 = inlined_call_operand.vmem [shape: f32[32,16], index: 8, kind: input, shape index: {}]   ;;  %s1526_s9 = inlined_call_operand.vmem [shape: f32[32,32], index: 9, kind: input, shape index: {}]   ;;  %s1527_s10 = inlined_call_operand.hbm [shape: f32[2,8,32], index: 10, kind: output, shape index: {0}]   ;;  %s1528_s11 = inlined_call_operand.vmem [shape: f32[2,32,16], index: 11, kind: output, shape index: {1}]  }
   0x1   :  { %1529 = sst [smem:[#allocation5_spill]] %s1517_s0 }
   0x2   :  { %1530 = sst [smem:[#allocation6_spill]] %s1518_s1 }
   0x3   :  { %1531 = sst [smem:[#allocation7_spill]] %s1519_s2 }
   0x4   :  { %1532 = sst [smem:[#allocation8_spill]] %s1524_s7 }
   0x5   :  { %17 = vsyncpa [#allocation3], 0 }
   0x6   :  { %19 = vsyncpa [#allocation3 + $0x1], 0  ;;  %s1263_s17 = smov 0   ;;  %s1265_s18 = smov 0  }
   0x7   :  { %s1267_s19 = smov 0   ;;  %s1269_s20 = smov 0  }
   0x8   :  { %s1271_s21 = smov 0   ;;  %s1273_s22 = smov 0  }
   0x9 LB: > { %s1007_s23 = sadd.s32 4294967295, %s1195_s22   ;;  %s1008_s24 = sadd.s32 4294967294, %s1195_s22   ;;  %s1195_s22 = sphi %s1273_s22, %s25_s22   ;;  %s1191_s21 = sphi %s1271_s21, %s1543_s21   ;;  %s1187_s20 = sphi %s1269_s20, %s1542_s20   ;;  %s1183_s19 = sphi %s1267_s19, %s1541_s19   ;;  %s1179_s18 = sphi %s1265_s18, %s1540_s18   ;;  %s1175_s17 = sphi %s1263_s17, %s1539_s17  }
   0xa   : > { %s37_s25 = sadd.s32 1, %s1191_s21  ;;  %s263_s26 = sadd.s32 1, %s1183_s19 }
   0xb   : > { %p39_p0 = scmp.ge.s32.totalorder %s37_s25, 2  ;;  %p273_p1 = scmp.ne.s32.totalorder %s1183_s19, %s1179_s18 }
   0xc   : > { %p274_p2 = scmp.eq.s32.totalorder %s1007_s23, 1  ;;  %p279_p3 = scmp.ne.s32.totalorder %s1179_s18, %s1175_s17 }
   0xd   : > { %s1545_s25 = smov (%p39_p0, %s37_s25), 0  ;;  %p280_p5 = scmp.eq.s32.totalorder %s1008_s24, 1 }
   0xe   : > { %p1303_p4 = por %p274_p2, %p273_p1  ;;  %s258_s28 = ssub.s32 %s1191_s21, %s1545_s25 }
   0xf   : > { %p1011_p6 = scmp.ge.s32.totalorder %s1195_s22, 1  ;;  %p261_p7 = scmp.eq.s32.totalorder %s258_s28, 0 }
  0x10   : > { %p1310_p8 = por %p280_p5, %p279_p3  ;;  %p361_p9 = scmp.lt.s32.totalorder %s1195_s22, 3 }
  0x11   : > { %s1316_s30 = scalar_select %p261_p7, %s1183_s19, %s263_s26  }
  0x12   : > { %p362_p10 = pnand %p1011_p6, %p361_p9 }
  0x13   : > { %s1535_s1 = sld [smem:[#allocation6_spill]] (!%p362_p10)  ;;  %p408_p11 = scmp.lt.s32.totalorder (!%p362_p10), %s1187_s20, 1 }
  0x14   : > { %365 = sbr.rel (%p362_p10) target bundleno = 1385 (0x569), region = 60  ;;  %s1536_s7 = sld [smem:[#allocation8_spill]] (!%p362_p10) }
  0x15   : > { %s1197_s15 = smov (!%p362_p10), 48   ;;  %s1537_s0 = sld [smem:[#allocation5_spill]] (!%p362_p10) }
  0x16   : > { %s1538_s2 = sld [smem:[#allocation7_spill]] (!%p362_p10)  ;;  %s1201_s26 = smov (!%p362_p10), 80  }
  0x19   : > { %v433_v0 = vld [vmem:[%s1535_s1 + $0x18] sm:$0xff]  ;;  %v432_v1 = vld [vmem:[%s1535_s1 + $0x10] sm:$0xff]  ;;  %v431_v3 = vld [vmem:[%s1535_s1 + $0x8] sm:$0xff]  ;;  %s1334_s28 = scalar_select %p408_p11, %s1187_s20, 1  ;;  %vm438_vm0 = vcmask 261120   ;;  %vm424_vm1 = vcmask 130048  }
  0x1a   : > { %454 = vmatpush.msra.mxu3 %v433_v0  ;;  %v1328_v2 = vld [vmem:[%s1536_s7] sm:$0x3]  ;;  %s1198_s7 = smov 96   ;;  %v1199_v20 = vmov 0.0   ;;  %vm477_vm2 = vcmask 64512   ;;  %v787_v63 = vld [vmem:[%s1526_s9 + $0x18] sm:$0xff] }
  0x1b   : > { %v649_v4 = vperm.slane %v1328_v2, 1  ;;  %v430_v5 = vld [vmem:[%s1535_s1] sm:$0xff]  ;;  %s1013_s14 = sshll.u32 %s1334_s28, 3  ;;  %s1040_s12 = sshll.u32 %s1334_s28, 5  ;;  %v555_v36 = vperm.slane %v1328_v2, 0  ;;  %v786_v0 = vld [vmem:[%s1526_s9 + $0x10] sm:$0xff] }
  0x1c   : > { %455 = vmatpush.msra.mxu3 %v432_v1  ;;  %s414_s24 = scalar_lea.vmem %s1537_s0, %s1013_s14  ;;  %v1102_v7 = vld [vmem:[%s1538_s2] ss:$0 sm:$0xff]  ;;  %s1357_s16 = scalar_lea.vmem %s1528_s11, %s1040_s12  ;;  %v785_v1 = vld [vmem:[%s1526_s9 + $0x8] sm:$0xff] }
  0x1d   : > { %651 = vrot.lane.b32.xlu2 %v649_v4, %s1197_s15  ;;  %v429_v6 = vld [vmem:[%s414_s24] sm:$0xff]  ;;  %428 = vst.msk [vmem:[%s1357_s16 + $0x18] sm:$0xff] %vm424_vm1, %v1199_v20  ;;  %s1200_s24 = smov 16   ;;  %s1037_s14 = sshll.u32 %s1187_s20, 3 }
  0x1e   : > { %456 = vmatpush.msra.mxu3 %v431_v3  ;;  %425 = vst.msk [vmem:[%s1357_s16] sm:$0xff] %vm424_vm1, %v1199_v20  ;;  %v472_v21 = vld [vmem:[%s1522_s5] sm:$0xff]  ;;  %s903_s23 = scalar_lea.hbm %s1527_s10, %s1037_s14  ;;  %s1137_s14 = scalar_lea.hbm %s1527_s10, 16 }
  0x1f   : > { %426 = vst.msk [vmem:[%s1357_s16 + $0x8] sm:$0xff] %vm424_vm1, %v1199_v20  ;;  %v521_v38 = vld [vmem:[%s1523_s6] sm:$0x3] }
  0x20   : > { %457 = vmatpush.msra.mxu3 %v430_v5  ;;  %427 = vst.msk [vmem:[%s1357_s16 + $0x10] sm:$0xff] %vm424_vm1, %v1199_v20  ;;  %v523_v40 = vperm.slane %v521_v38, 0  ;;  %v623_v41 = vperm.slane %v521_v38, 1  ;;  %v520_v58 = vld [vmem:[%s1521_s4] sm:$0xff]  ;;  %v860_v38 = vld [vmem:[%s1520_s3 + $0x10] sm:$0xff] }
  0x21   : > { %1016 = vmatmul.msk.f32.vlgmr.msra.gmra.mxu3 %vm438_vm0, %v429_v6  ;;  %v784_v2 = vld [vmem:[%s1526_s9] sm:$0xff] }
  0x24   : > { %v1371_v23 = vld [vmem:[%s1357_s16 + $0x18] sm:$0xff] }
  0x25   : > { %v1387_v26 = vld [vmem:[%s1357_s16] sm:$0xff] }
  0x26   : > { %v1382_v25 = vld [vmem:[%s1357_s16 + $0x8] sm:$0xff] }
  0x27   : > { %v1377_v24 = vld [vmem:[%s1357_s16 + $0x10] sm:$0xff] }
  0x77   : > { %v652_v32 = vpop.permute.xlu2 %651 }
  0xa4   : > { %v459_v8 = vpop.f32.mrf.mxu3 }
  0xa5   : > { %v1349_v9 = vadd.f32 %v1102_v7, %v459_v8 }
  0xa7   : > { %v463_v10 = vand.u32 2147483647, %v1349_v9  ;;  %v462_v16 = vmin.f32 %v1349_v9, 0.0  ;;  %v654_v33 = vmul.f32 %v652_v32, %v1349_v9  ;;  %v847_v39 = vsub.f32 0.0, %v1349_v9  ;;  %v771_v32 = vld [vmem:[%s1525_s8 + $0x18] sm:$0xff] }
  0xa9   : > { %v464_v11 = vsub.f32 0.0, %v463_v10  ;;  %v848_v42 = vmul.f32 1.442695, %v847_v39  ;;  %v859_v39 = vld [vmem:[%s1520_s3 + $0x8] sm:$0xff] }
  0xab   : > { %v465_v12 = vmul.f32 1.442695, %v464_v11 }
  0xad   : > { %1103 = vpow2.f32 %v465_v12  ;;  %v768_v12 = vld [vmem:[%s1525_s8] sm:$0xff] }
  0xb3   : > { %v1104_v13 = vpop.eup %1103 }
  0xb4   : > { %v467_v14 = vadd.f32 1.0, %v1104_v13 }
  0xb6   : > { %1105 = vlog2.f32 %v467_v14 }
  0xbc   : > { %v1106_v15 = vpop.eup %1105 }
  0xbd   : > { %v469_v17 = vmul.f32 0.6931472, %v1106_v15 }
  0xbf   : > { %v470_v18 = vsub.f32 %v462_v16, %v469_v17  ;;  %v769_v17 = vld [vmem:[%s1525_s8 + $0x8] sm:$0xff] }
  0xc1   : > { %v471_v19 = vmul.f32 0.0625, %v470_v18 }
  0xc3   : > { %474 = vrot.lane.b32.xlu0 %v471_v19, %s1198_s7  ;;  %s1202_s7 = smov 112  }
 0x135   : > { %v475_v22 = vpop.permute.xlu0 %474 }
 0x136   : > { %496 = vmatpush.msra.mxu1 %v475_v22 }
 0x137   : > { %1017 = vmatmul.msk.f32.vlgmr.msra.gmra.mxu1 %vm477_vm2, %v472_v21 }
 0x138   : > { %1021 = vmatpush.xpose.msk.msrb.mxu1 %vm424_vm1, %v1371_v23 }
 0x13c   : > { %1022 = vmatpush.xpose.msk.msrb.mxu1 %vm424_vm1, %v1377_v24 }
 0x140   : > { %1023 = vmatpush.xpose.msk.msrb.mxu1 %vm424_vm1, %v1382_v25 }
 0x144   : > { %1024 = vmatpush.xpose.msk.msrb.mxu1 %vm424_vm1, %v1387_v26 }
 0x1b4   : > { %v498_v27 = vpop.f32.mrf.mxu1 }
 0x1b5   : > { %v501_v28 = vmul.f32 1.442695, %v498_v27 }
 0x1b7   : > { %1107 = vpow2.f32 %v501_v28  ;;  %v770_v28 = vld [vmem:[%s1525_s8 + $0x10] sm:$0xff] }
 0x1bd   : > { %v1108_v29 = vpop.eup %1107 }
 0x1be   : > { %v503_v30 = vmul.f32 %v1108_v29, %v1349_v9  ;;  %1109 = vrcp.f32 %v1108_v29  ;;  %v1398_v37 = vperm.slane %v1108_v29, 7 }
 0x1bf   : > { %1111 = vpow2.f32 %v848_v42 }
 0x1c0   : > { %1025 = vmatmul.msk.f32.vlgmr.msrb.gmra.mxu1 %vm424_vm1, %v503_v30  ;;  %v524_v44 = vmul.f32 %v523_v40, %v503_v30  ;;  %v624_v45 = vmul.f32 %v623_v41, %v503_v30  ;;  %v764_v14 = vmul.f32 %v1387_v26, %v1398_v37  ;;  %v765_v19 = vmul.f32 %v1382_v25, %v1398_v37 }
 0x1c1   : > { %v766_v30 = vmul.f32 %v1377_v24, %v1398_v37  ;;  %v861_v24 = vld [vmem:[%s1520_s3 + $0x18] sm:$0xff] }
 0x1c2   : > { %877 = vmatpush.msra.mxu1 %v861_v24 }
 0x1c4   : > { %v1110_v31 = vpop.eup %1109  ;;  %878 = vmatpush.msra.mxu1 %v860_v38 }
 0x1c5   : > { %506 = vrot.lane.b32.xlu0 %v1110_v31, %s1200_s24  ;;  %v1112_v47 = vpop.eup %1111 }
 0x1c6   : > { %v850_v49 = vadd.f32 1.0, %v1112_v47  ;;  %879 = vmatpush.msra.mxu1 %v859_v39 }
 0x1c8   : > { %1113 = vrcp.f32 %v850_v49 }
 0x1cd   : > { %656 = vrot.lane.b32.xlu0 %v654_v33, %s1201_s26 }
 0x1ce   : > { %v1114_v52 = vpop.eup %1113 }
 0x1cf   : > { %v852_v53 = vmul.f32 %v1114_v52, %v1349_v9 }
 0x237   : > { %v507_v34 = vpop.permute.xlu0 %506 }
 0x238   : > { %v509_v35 = vmul.f32 %v507_v34, %v1349_v9  ;;  %v767_v34 = vmul.f32 %v1371_v23, %v1398_v37  ;;  %v858_v23 = vld [vmem:[%s1520_s3] sm:$0xff] }
 0x239   : > { %880 = vmatpush.msra.mxu1 %v858_v23 }
 0x23a   : > { %526 = vrot.lane.b32.xlu1 %v509_v35, %s1202_s7 }
 0x23d   : > { %v620_v5 = vpop.f32.mrf.mxu1 }
 0x23f   : > { %v657_v55 = vpop.permute.xlu0 %656 }
 0x242   : > { %557 = vrot.lane.b32.xlu1 %v555_v36, %s1197_s15 }
 0x24a   : > { %512 = vrot.lane.b32.xlu1 %v1398_v37, %s1200_s24 }
 0x2ac   : > { %v527_v43 = vpop.permute.xlu1 %526 }
 0x2ad   : > { %1018 = vmatpush.xpose.msk.msra.mxu2 %vm424_vm1, %v527_v43  ;;  %1026 = vmatpush.xpose.msk.msrb.mxu3 %vm424_vm1, %v527_v43 }
 0x2b0   : > { %1019 = vmatmul.msk.f32.vlgmr.msra.gmra.mxu2 %vm424_vm1, %v524_v44  ;;  %1027 = vmatmul.msk.f32.vlgmr.msrb.gmra.mxu3 %vm424_vm1, %v624_v45 }
 0x2b1   : > { %803 = vmatpush.msra.mxu3 %v787_v63 }
 0x2b3   : > { %804 = vmatpush.msra.mxu3 %v786_v0 }
 0x2b4   : > { %v558_v46 = vpop.permute.xlu1 %557 }
 0x2b5   : > { %v560_v48 = vmul.f32 %v558_v46, %v1349_v9  ;;  %805 = vmatpush.msra.mxu3 %v785_v1 }
 0x2b7   : > { %562 = vrot.lane.b32.xlu2 %v560_v48, %s1201_s26  ;;  %806 = vmatpush.msra.mxu3 %v784_v2 }
 0x2bc   : > { %v513_v50 = vpop.permute.xlu1 %512 }
 0x2bd   : > { %v515_v51 = vmul.f32 %v513_v50, %v509_v35 }
 0x2bf   : > { %684 = vrot.lane.b32.xlu2 %v1349_v9, %s1201_s26  ;;  %720 = vrot.lane.b32.xlu0 %v515_v51, %s1202_s7  ;;  %s907_s7 = sshll.u32 %s903_s23, 4  ;;  %s908_s7 = int_to_ptr.hbm [resolvable:$true] %s907_s7 }
 0x2c0   : > { %s1131_s0 = sshra.s32 %s908_s7, 4  ;;  %s1132_s0 = int_to_ptr.hbm [resolvable:$true] %s1131_s0 }
 0x2c1   : > { %s1133_s1 = scalar_lea.hbm %s1132_s0, 8  ;;  %p1138_p1 = scmp.lt.s32.totalorder %s1132_s0, %s1527_s10 }
 0x2c2   : > { %p1134_p12 = scmp.ne.s32.totalorder %s1132_s0, %s1133_s1  ;;  %p1139_p2 = scmp.lt.s32.totalorder %s1137_s14, %s1133_s1 }
 0x2c4   : > { %p1135_p13 = pnand %p1134_p12, %p1303_p4  ;;  %p1140_p3 = por %p1139_p2, %p1138_p1 }
 0x2c6   : > { %p1136_p0 = pneg %p1135_p13 }
 0x2c7   : > { %854 = vrot.lane.b32.xlu2 %v852_v53, %s1197_s15 }
 0x2c8   : > { %p1141_p5 = pnand %p1140_p3, %p1136_p0 }
 0x311   : > { %v563_v54 = vpop.permute.xlu2 %562 }
 0x312   : > { %583 = vmatpush.msrb.mxu2 %v563_v54 }
 0x314   : > { %677 = vmatpush.msra.mxu2 %v657_v55 }
 0x319   : > { %v685_v56 = vpop.permute.xlu2 %684 }
 0x31a   : > { %687 = vxpose.xlu1.b32.start.end [1/1] (short) (narrow) %v685_v56, 32 }
 0x321   : > { %v855_v49 = vpop.permute.xlu2 %854 }
 0x331   : > { %v721_v57 = vpop.permute.xlu0 %720 }
 0x332   : > { %750 = vmatpush.msra.mxu0 %v721_v57 }
 0x333   : > { %v551_v59 = vpop.f32.mrf.mxu2  ;;  %v645_v61 = vpop.f32.mrf.mxu3 }
 0x334   : > { %v554_v60 = vmul.f32 %v551_v59, %v520_v58  ;;  %v648_v62 = vmul.f32 %v645_v61, %v520_v58 }
 0x336   : > { %1020 = vmatmul.msk.f32.vlgmr.msrb.gmra.mxu2 %vm477_vm2, %v554_v60 }
 0x337   : > { %828 = vmatpush.msrb.mxu2 %v787_v63 }
 0x339   : > { %829 = vmatpush.msrb.mxu2 %v786_v0 }
 0x33b   : > { %830 = vmatpush.msrb.mxu2 %v785_v1 }
 0x33d   : > { %831 = vmatpush.msrb.mxu2 %v784_v2 }
 0x33e   : > { %1028 = vmatmul.msk.f32.vlgmr.msra.gmra.mxu2 %vm477_vm2, %v648_v62 }
 0x3b9   : > { %v585_v3 = vpop.f32.mrf.mxu2 }
 0x3ba   : > { %v621_v6 = vadd.f32 %v620_v5, %v585_v3 }
 0x3be   : > { %v703_v4 = vpop.trf.xlu1 }
 0x3bf   : > { %1029 = vmatmul.msk.f32.vlgmr.msra.gmra.mxu0 %vm477_vm2, %v703_v4 }
 0x3c1   : > { %v679_v7 = vpop.f32.mrf.mxu2 }
 0x3c2   : > { %v682_v8 = vadd.f32 %v679_v7, %v621_v6 }
 0x3c4   : > { %1033 = vmatmul.msk.f32.vlgmr.msra.gmra.mxu3 %vm438_vm0, %v682_v8 }
 0x3c6   : > { %v704_v9 = vpop.trf.xlu1 }
 0x3c7   : > { %1030 = vmatmul.msk.f32.gmra.mxu0 %vm477_vm2, %v704_v9 }
 0x3ce   : > { %v705_v10 = vpop.trf.xlu1 }
 0x3cf   : > { %1031 = vmatmul.msk.f32.gmra.mxu0 %vm477_vm2, %v705_v10 }
 0x3d6   : > { %v706_v11 = vpop.trf.xlu1 }
 0x3d7   : > { %1032 = vmatmul.msk.f32.gmra.mxu0 %vm477_vm2, %v706_v11 }
 0x43c   : > { %v752_v13 = vpop.f32.mrf.mxu0 }
 0x43d   : > { %v772_v15 = vmul.f32 %v768_v12, %v752_v13 }
 0x43f   : > { %v776_v16 = vadd.f32 %v772_v15, %v764_v14 }
 0x441   : > { %780 = vst.msk [vmem:[%s1357_s16] sm:$0xff] %vm424_vm1, %v776_v16 }
 0x444   : > { %v755_v18 = vpop.f32.mrf.mxu0 }
 0x445   : > { %v773_v20 = vmul.f32 %v769_v17, %v755_v18 }
 0x447   : > { %v777_v21 = vadd.f32 %v773_v20, %v765_v19  ;;  %v808_v22 = vpop.f32.mrf.mxu3 }
 0x448   : > { %v811_v27 = vsub.f32 %v682_v8, %v808_v22 }
 0x449   : > { %781 = vst.msk [vmem:[%s1357_s16 + $0x8] sm:$0xff] %vm424_vm1, %v777_v21 }
 0x44a   : > { %v812_v26 = vmul.f32 %v811_v27, %v811_v27 }
 0x44c   : > { %v758_v29 = vpop.f32.mrf.mxu0  ;;  %1034 = vmatmul.msk.f32.vlgmr.msrb.gmra.mxu2 %vm438_vm0, %v812_v26 }
 0x44d   : > { %v774_v31 = vmul.f32 %v770_v28, %v758_v29 }
 0x44f   : > { %v778_v25 = vadd.f32 %v774_v31, %v766_v30 }
 0x451   : > { %782 = vst.msk [vmem:[%s1357_s16 + $0x10] sm:$0xff] %vm424_vm1, %v778_v25 }
 0x454   : > { %v761_v33 = vpop.f32.mrf.mxu0 }
 0x455   : > { %v775_v35 = vmul.f32 %v771_v32, %v761_v33 }
 0x457   : > { %v779_v36 = vadd.f32 %v775_v35, %v767_v34 }
 0x459   : > { %783 = vst.msk [vmem:[%s1357_s16 + $0x18] sm:$0xff] %vm424_vm1, %v779_v36  ;;  %s398_s16 = sand.u32 1, %s1179_s18  }
 0x45a   : > { %s1012_s13 = sshll.u32 %s398_s16, 3  ;;  %s887_s12 = scalar_lea.sflag [#allocation3], %s398_s16 }
 0x45b   : > { %s400_s24 = scalar_lea.vmem [#allocation2], %s1012_s13 }
 0x45c   : > { %s905_s26 = sshll.u32 %s400_s24, 4  ;;  %s906_s26 = int_to_ptr.vmem [resolvable:$true] %s905_s26 }
 0x4cf   : > { %v833_v37 = vpop.f32.mrf.mxu2 }
 0x4d0   : > { %v834_v40 = vadd.f32 1e-05, %v833_v37 }
 0x4d2   : > { %1115 = vrsqrt.f32 %v834_v40  ;;  %vm842_vm4 = vweird.f32 %v834_v40 }
 0x4d8   : > { %v1116_v41 = vpop.eup %1115 }
 0x4d9   : > { %v837_v42 = vmul.f32 %v1116_v41, %v834_v40  ;;  %vm843_vm3 = vweird.f32 %v1116_v41 }
 0x4da   : > { %vm844_vm5 = vmor %vm842_vm4, %vm843_vm3 }
 0x4db   : > { %v838_v43 = vmul.f32 %v1116_v41, %v837_v42 }
 0x4dd   : > { %v839_v44 = vmul.f32 0.5, %v838_v43 }
 0x4df   : > { %v840_v45 = vsub.f32 1.5, %v839_v44 }
 0x4e1   : > { %v841_v46 = vmul.f32 %v1116_v41, %v840_v45 }
 0x4e3   : > { %v845_v47 = vsel %vm844_vm5, %v1116_v41, %v841_v46 }
 0x4e4   : > { %v846_v48 = vmul.f32 %v845_v47, %v811_v27 }
 0x4e6   : > { %v857_v50 = vmul.f32 %v855_v49, %v846_v48 }
 0x4e8   : > { %1035 = vmatmul.msk.f32.vlgmr.msra.gmra.mxu1 %vm438_vm0, %v857_v50 }
 0x565   : > { %v882_v51 = vpop.f32.mrf.mxu1 }
 0x566   : > { %885 = vst.msk [vmem:[%s400_s24] sm:$0xff] %vm438_vm0, %v882_v51 }
 0x567   : > { %1144 = shalt.err (!%p1141_p5)
}
 0x568   : > { %1041 = dma.vmem_to_hbm [thread:$0]  (%p1303_p4), %s906_s26, 128, %s908_s7, %s887_s12  }
 0x569 PF: > { %p1047_p6 = scmp.ge.s32.totalorder %s1195_s22, 2  ;;  %s922_s16 = sand.u32 1, %s1175_s17  }
 0x56a   : > { %s923_s2 = scalar_lea.sflag [#allocation3], %s922_s16 }
 0x56b   : > { %p1044_p7 = pnand %p1047_p6, %p1310_p8 }
 0x56d   : > { %p1045_p9 = pneg %p1044_p7 }
 0x56f   : > { %1170 = dma.done.wait (%p1045_p9), %s923_s2, 128  }
 0x570   : > { %1172 = vsyncadd (%p1045_p9), %s923_s2, 4294967168  ;;  %s25_s22 = sadd.s32 1, %s1195_s22   ;;  %s1539_s17 = smov %s1179_s18 }
 0x571   : > { %p22_p10 = scmp.ge.s32.totalorder %s25_s22, 4   ;;  %s1540_s18 = smov %s1183_s19 }
 0x572   : > { %s1541_s19 = smov %s1316_s30  ;;  %s1542_s20 = smov %s1191_s21 }
 0x573   : > { %s1543_s21 = smov %s1545_s25  ;;  %24 = sbr.rel (!%p22_p10) target bundleno = 9 (0x9), region = 111 }
 0x578   :  { %937 = vsyncpa [#allocation3], 1 }
 0x579   :  { %939 = vsyncpa [#allocation3 + $0x1], 1 }

</bundles_post_ra>
